<compile_context>
chip_gen: v5e
topology: v5e:2x2
jax: 0.10.0
libtpu: 0.0.40
codegen_flags: <defaults>
</compile_context>

<pallas_src>
import jax
import jax.numpy as jnp
from jax.experimental import pallas as pl
from jax.experimental.pallas import tpu as pltpu

_LANE = 128
_SUBLANE = 8


def _round_up(x, m):
    return ((x + m - 1) // m) * m


def _tagger_kernel_bias(x_ref, w_ref, b_ref, o_ref):
    # x_ref: [TM, D], w_ref: [D, L_pad], b_ref: [1, L_pad], o_ref: [TM, L]
    L = o_ref.shape[1]
    acc = jnp.dot(x_ref[...], w_ref[...], preferred_element_type=jnp.float32)
    acc = acc + b_ref[...].astype(jnp.float32)  # broadcast [1, L_pad] over rows
    o_ref[...] = acc[:, :L].astype(o_ref.dtype)  # store only real label columns


def _tagger_kernel_nobias(x_ref, w_ref, o_ref):
    L = o_ref.shape[1]
    acc = jnp.dot(x_ref[...], w_ref[...], preferred_element_type=jnp.float32)
    o_ref[...] = acc[:, :L].astype(o_ref.dtype)


def prepare_tagger_params(weight, bias):
    """One-time parameter layout: PyTorch weight [L, D] -> [D, L_pad]
    (lane-padded with zeros for the MXU), bias [L] -> [1, L_pad] (or None).
    Do this at init time, not per forward call."""
    L, D = weight.shape
    L_pad = _round_up(max(L, _LANE), _LANE)
    w_t = jnp.zeros((D, L_pad), dtype=weight.dtype).at[:, :L].set(weight.T)
    if bias is None:
        b2d = None
    else:
        b2d = jnp.zeros((1, L_pad), dtype=bias.dtype).at[:, :L].set(
            bias.reshape(1, L)
        )
    return w_t, b2d, L


def tagger_forward(x, w_t, b2d, n_labels, tm=8192):
    """x: [B, T, D]; w_t: [D, L_pad] (from prepare_tagger_params);
    b2d: [1, L_pad] or None; returns [B, T, n_labels]."""
    B, T, D = x.shape
    L_pad = w_t.shape[1]
    M = B * T
    x2d = x.reshape(M, D)  # metadata-only reshape

    itemsize = jnp.dtype(x.dtype).itemsize
    # Sublane packing grain: 8 rows (f32), 16 (bf16), 32 (8-bit).
    grain = _SUBLANE * max(1, 4 // itemsize)

    # Correctness: a user-supplied tm must itself respect the sublane grain.
    tm = _round_up(max(tm, grain), grain)
    TM = min(tm, _round_up(M, grain))
    # Keep >= 2 grid steps when there is enough work so the "parallel" row axis
    # can be sharded across v7x's two TensorCores (harmless on v5e/v6e — tiles
    # stay >= 512 rows, still ~85-90% of HBM roofline).
    half = _round_up((M + 1) // 2, grain)
    if half >= 512:
        TM = min(TM, half)

    # Ragged last tile: Pallas masks/drops out-of-bounds output rows.
    grid = (pl.cdiv(M, TM),)

    # VMEM budget: double-buffered x + out tiles, weight/bias buffers, plus
    # headroom for compiler scratch; clamped to the physical device VMEM.
    w_itemsize = jnp.dtype(w_t.dtype).itemsize
    needed = (
        2 * TM * D * itemsize
        + 2 * TM * n_labels * itemsize
        + 2 * D * L_pad * w_itemsize
        + 2 * L_pad * 4
    )
    try:
        vmem_cap = int(pltpu.get_tpu_info().vmem_capacity_bytes)
    except Exception:
        vmem_cap = 64 * 2**20  # conservative: v7x per-TensorCore VMEM
    vmem_limit = int(min(max(needed + 8 * 2**20, 32 * 2**20), vmem_cap - 16 * 2**20))

    # Note: weight/bias have constant index maps so they are fetched once and
    # stay resident; the extra default buffer is only D*L_pad bytes, so we skip
    # pipeline_mode tweaks for them.
    in_specs = [
        pl.BlockSpec((TM, D), lambda i: (i, 0)),      # x tile, pipelined over rows
        pl.BlockSpec((D, L_pad), lambda i: (0, 0)),   # weight, VMEM-resident
    ]
    args = [x2d, w_t]
    if b2d is not None:
        in_specs.append(pl.BlockSpec((1, L_pad), lambda i: (0, 0)))
        args.append(b2d)
        kernel = _tagger_kernel_bias
    else:
        kernel = _tagger_kernel_nobias

    # Un-padded output: block last dim == full array dim (n_labels), so the
    # (8,128) rule is satisfied and no padded slab / post-kernel slice exists.
    out_specs = pl.BlockSpec((TM, n_labels), lambda i: (i, 0))

    flops = 2 * M * D * L_pad
    bytes_accessed = (
        M * D * itemsize
        + D * L_pad * w_itemsize
        + (L_pad * jnp.dtype(b2d.dtype).itemsize if b2d is not None else 0)
        + M * n_labels * itemsize
    )

    out2d = pl.pallas_call(
        kernel,
        out_shape=jax.ShapeDtypeStruct((M, n_labels), x.dtype),
        grid_spec=pl.GridSpec(grid=grid, in_specs=in_specs, out_specs=out_specs),
        compiler_params=pltpu.CompilerParams(
            dimension_semantics=("parallel",),  # independent row tiles
            vmem_limit_bytes=vmem_limit,
        ),
        cost_estimate=pl.CostEstimate(
            flops=flops, transcendentals=0, bytes_accessed=bytes_accessed
        ),
    )(*args)

    return out2d.reshape(B, T, n_labels)


if __name__ == "__main__":
    # Small shapes consistent with the module: batch=2, seq=8, input_dim=32, n_labels=16
    B, T, D, L = 2, 8, 32, 16

    key = jax.random.PRNGKey(0)
    kx, kw, kb = jax.random.split(key, 3)

    x = jax.random.normal(kx, (B, T, D), dtype=jnp.float32)
    # Deterministic parameter init (PyTorch-like uniform scale 1/sqrt(D))
    bound = 1.0 / (D ** 0.5)
    weight = jax.random.uniform(kw, (L, D), dtype=jnp.float32, minval=-bound, maxval=bound)
    bias = jax.random.uniform(kb, (L,), dtype=jnp.float32, minval=-bound, maxval=bound)

    # One-time parameter layout (transpose + lane-pad happens here, not per call).
    w_t, b2d, n_labels = prepare_tagger_params(weight, bias)

    out = tagger_forward(x, w_t, b2d, n_labels)
    out = jax.block_until_ready(out)

    # Reference check in plain JAX
    ref = x @ weight.T + bias
    assert out.shape == (B, T, L)
    assert jnp.allclose(out, ref, atol=1e-5, rtol=1e-5)

    # Also exercise the bias=False kernel variant.
    w_t_nb, b_nb, n_labels_nb = prepare_tagger_params(weight, None)
    out_nb = jax.block_until_ready(tagger_forward(x, w_t_nb, b_nb, n_labels_nb))
    assert jnp.allclose(out_nb, x @ weight.T, atol=1e-5, rtol=1e-5)

    # Exercise a ragged / multi-tile path (M not a multiple of the tile) to
    # cover the cdiv-grid masking and the >=2-step v7x cap.
    B2, T2 = 3, 347  # M = 1041
    x_big = jax.random.normal(kx, (B2, T2, D), dtype=jnp.float32)
    out_big = jax.block_until_ready(tagger_forward(x_big, w_t, b2d, n_labels))
    ref_big = x_big @ weight.T + bias
    assert out_big.shape == (B2, T2, L)
    assert jnp.allclose(out_big, ref_big, atol=1e-4, rtol=1e-4)

    print("KERNEL_OK")
</pallas_src>

<mosaic_0001>
module attributes {stable_mosaic.version = 11 : i64} {
  func.func @_tagger_kernel_bias(%arg0: i32, %arg1: memref<16x32xf32, #tpu.memory_space<vmem>>, %arg2: memref<32x128xf32, #tpu.memory_space<vmem>>, %arg3: memref<1x128xf32, #tpu.memory_space<vmem>>, %arg4: memref<16x16xf32, #tpu.memory_space<vmem>>) attributes {dimension_semantics = [#tpu.dimension_semantics<parallel>], iteration_bounds = array<i64: 1>, scalar_prefetch = 0 : i64, scratch_operands = 0 : i64, tpu.core_type = #tpu.core_type<tc>, window_params = [{transform_indices = @transform_0, window_bounds = array<i64: 16, 32>}, {pipeline_mode = #tpu.pipeline_mode<synchronous>, transform_indices = @transform_1, window_bounds = array<i64: 32, 128>}, {pipeline_mode = #tpu.pipeline_mode<synchronous>, transform_indices = @transform_2, window_bounds = array<i64: 1, 128>}, {transform_indices = @transform_3, window_bounds = array<i64: 16, 16>}]} {
    %c0 = arith.constant 0 : index
    %c0_0 = arith.constant 0 : index
    %0 = vector.load %arg1[%c0, %c0_0] : memref<16x32xf32, #tpu.memory_space<vmem>>, vector<16x32xf32>
    %c0_1 = arith.constant 0 : index
    %c0_2 = arith.constant 0 : index
    %1 = vector.load %arg2[%c0_1, %c0_2] : memref<32x128xf32, #tpu.memory_space<vmem>>, vector<32x128xf32>
    %cst = arith.constant dense<0.000000e+00> : vector<16x128xf32>
    %2 = tpu.matmul %0, %1, %cst {dimension_numbers = #tpu.dot_dimension_numbers<[1], [0], [0], [1], [0, 0, 1, 1], [], []>} : vector<16x32xf32>, vector<32x128xf32>, vector<16x128xf32> -> vector<16x128xf32>
    %c0_3 = arith.constant 0 : index
    %c0_4 = arith.constant 0 : index
    %3 = vector.load %arg3[%c0_3, %c0_4] : memref<1x128xf32, #tpu.memory_space<vmem>>, vector<1x128xf32>
    %4 = vector.broadcast %3 : vector<1x128xf32> to vector<16x128xf32>
    %5 = arith.addf %2, %4 : vector<16x128xf32>
    %6 = vector.extract_strided_slice %5 {offsets = [0, 0], sizes = [16, 16], strides = [1, 1]} : vector<16x128xf32> to vector<16x16xf32>
    %c0_5 = arith.constant 0 : index
    %c0_6 = arith.constant 0 : index
    %7 = vector.load %arg4[%c0_5, %c0_6] : memref<16x16xf32, #tpu.memory_space<vmem>>, vector<16x16xf32>
    tpu.vector_store %arg4[%c0_5, %c0_6], %6 {strides = array<i32>} : memref<16x16xf32, #tpu.memory_space<vmem>>, vector<16x16xf32>,
    return
  }
  func.func @transform_0(%arg0: i32) -> (i32, i32) {
    %c0_i32 = arith.constant 0 : i32
    %c0_i32_0 = arith.constant 0 : i32
    return %arg0, %c0_i32 : i32, i32
  }
  func.func @transform_1(%arg0: i32) -> (i32, i32) {
    %c0_i32 = arith.constant 0 : i32
    %c0_i32_0 = arith.constant 0 : i32
    %c0_i32_1 = arith.constant 0 : i32
    return %c0_i32, %c0_i32_0 : i32, i32
  }
  func.func @transform_2(%arg0: i32) -> (i32, i32) {
    %c0_i32 = arith.constant 0 : i32
    %c0_i32_0 = arith.constant 0 : i32
    %c0_i32_1 = arith.constant 0 : i32
    return %c0_i32, %c0_i32_0 : i32, i32
  }
  func.func @transform_3(%arg0: i32) -> (i32, i32) {
    %c0_i32 = arith.constant 0 : i32
    %c0_i32_0 = arith.constant 0 : i32
    return %arg0, %c0_i32 : i32, i32
  }
}

</mosaic_0001>

<bundles_post_ra>
// kernel: tpu_custom_call.1
= control target key start
LH: loop header
LB: loop body
LE: loop exit
PB: predicated region body
PF: predicated region fallthrough
CT: control target
= control target key end

     0   :  { %8 = vsyncpa [#allocation3], 0  ;;  %s246_s0 = inlined_call_operand.hbm [shape: f32[16,32], index: 0, kind: input, shape index: {}]   ;;  %s247_s1 = inlined_call_operand.hbm [shape: f32[32,128], index: 1, kind: input, shape index: {}]   ;;  %s248_s2 = inlined_call_operand.vmem [shape: f32[1,128], index: 2, kind: input, shape index: {}]   ;;  %s249_s3 = inlined_call_operand.hbm [shape: f32[16,16], index: 3, kind: output, shape index: {}]  }
   0x1   :  { %9 = vsyncpa [#allocation6], 0 }
   0x2   :  { %10 = vsyncpa [#allocation4], 0  ;;  %s15_s14 = sshll.u32 %s246_s0, 4  ;;  %s200_s15 = smov [#allocation2]   ;;  %s16_s14 = int_to_ptr.hbm [resolvable:$true] %s15_s14 }
   0x3   :  { %s17_s16 = sshll.u32 %s200_s15, 4  ;;  %s28_s19 = sshll.u32 %s247_s1, 4  ;;  %s18_s16 = int_to_ptr.vmem [resolvable:$true] %s17_s16  ;;  %s29_s19 = int_to_ptr.hbm [resolvable:$true] %s28_s19 }
   0x4   :  { %s201_s20 = smov 128   ;;  %s202_s21 = smov 8  }
   0x5   :  { %23 = dma.hbm_to_vmem [thread:$0]  %s16_s14, 256, %s18_s16, [#allocation3], %s201_s20, %s201_s20, %s202_s21  }
   0x6   :  { %s203_s22 = smov [#allocation5]  }
   0x7   :  { %s30_s23 = sshll.u32 %s203_s22, 4  ;;  %s31_s23 = int_to_ptr.vmem [resolvable:$true] %s30_s23 }
   0x8   :  { %36 = dma.hbm_to_vmem [thread:$0]  %s29_s19, 512, %s31_s23, [#allocation6], %s201_s20, %s201_s20, %s202_s21  }
   0x9   :  { %194 = dma.done.wait [#allocation3], 256  }
   0xa   :  { %195 = vsyncadd [#allocation3], 4294967040 }
   0xb   :  { %196 = dma.done.wait [#allocation6], 512  }
   0xc   :  { %197 = vsyncadd [#allocation6], 4294966784  ;;  %v52_v0 = vld [vmem:[#allocation5 + $0x18] sm:$0xff]  ;;  %v51_v1 = vld [vmem:[#allocation5 + $0x10] sm:$0xff]  ;;  %vm57_vm0 = vcmask 261120   ;;  %s204_s24 = smov [#allocation7]  }
   0xd   :  { %76 = vmatpush.msra.mxu0 %v52_v0  ;;  %112 = vmatpush.msra.mxu1 %v52_v0  ;;  %v50_v2 = vld [vmem:[#allocation5 + $0x8] sm:$0xff]  ;;  %v49_v3 = vld [vmem:[#allocation5] sm:$0xff]  ;;  %v47_v4 = vld [vmem:[#allocation2] sm:$0xff]  ;;  %s94_s25 = sshll.u32 %s204_s24, 4  ;;  %s96_s28 = sshll.u32 %s249_s3, 4  ;;  %vm87_vm1 = vcmask 130048   ;;  %s95_s25 = int_to_ptr.vmem [resolvable:$true] %s94_s25  ;;  %s97_s28 = int_to_ptr.hbm [resolvable:$true] %s96_s28 }
   0xe   :  { %v48_v5 = vld [vmem:[#allocation2 + $0x8] sm:$0xff]  ;;  %v121_v6 = vld [vmem:[%s248_s2] ss:$0 sm:$0xff] }
   0xf   :  { %77 = vmatpush.msra.mxu0 %v51_v1  ;;  %113 = vmatpush.msra.mxu1 %v51_v1 }
  0x11   :  { %78 = vmatpush.msra.mxu0 %v50_v2  ;;  %114 = vmatpush.msra.mxu1 %v50_v2 }
  0x13   :  { %79 = vmatpush.msra.mxu0 %v49_v3  ;;  %115 = vmatpush.msra.mxu1 %v49_v3 }
  0x14   :  { %110 = vmatmul.msk.f32.vlgmr.msra.gmra.mxu0 %vm57_vm0, %v47_v4  ;;  %111 = vmatmul.msk.f32.vlgmr.msra.gmra.mxu1 %vm57_vm0, %v48_v5 }
  0x91   :  { %v81_v7 = vpop.f32.mrf.mxu0  ;;  %v84_v8 = vpop.f32.mrf.mxu1 }
  0x92   :  { %v82_v9 = vadd.f32 %v121_v6, %v81_v7  ;;  %v85_v10 = vadd.f32 %v121_v6, %v84_v8 }
  0x94   :  { %88 = vst.msk [vmem:[#allocation7] sm:$0xff] %vm87_vm1, %v82_v9 }
  0x95   :  { %89 = vst.msk [vmem:[#allocation7 + $0x8] sm:$0xff] %vm87_vm1, %v85_v10 }
  0x96   :  { %102 = dma.vmem_to_hbm [thread:$0]  %s95_s25, 256, %s97_s28, [#allocation4], %s201_s20, %s201_s20, %s202_s21  }
  0x97   :  { %198 = dma.done.wait [#allocation4], 256  }
  0x98   :  { %199 = vsyncadd [#allocation4], 4294967040 }
  0x99   :  { %107 = vsyncpa [#allocation3], 1 }
  0x9a   :  { %108 = vsyncpa [#allocation6], 1 }
  0x9b   :  { %109 = vsyncpa [#allocation4], 1 }

</bundles_post_ra>
